<compile_context>
chip_gen: v7x
topology: tpu7x:2x2x1
jax: 0.10.0
libtpu: 0.0.40
codegen_flags: <defaults>
</compile_context>

<pallas_src>
import functools

import numpy as np
import jax
import jax.numpy as jnp
from jax import lax
from jax.experimental import pallas as pl
from jax.experimental.pallas import tpu as pltpu

N = 4
L = 2 ** N

# Fixed (non-trainable) conv weights from the module __init__ (numpy reference only).
H2_W0 = np.array([1.0, 1.0], dtype=np.float32)    # h_2_module.q0_conv
H2_W1 = np.array([0.0, 1.0], dtype=np.float32)    # h_2_module.q1_conv
SUB_W0 = np.array([1.0, -1.0], dtype=np.float32)  # subtraction_module.q0_conv
SUB_W1 = np.array([0.0, 1.0], dtype=np.float32)   # subtraction_module.q1_conv


def dst_kernel(m_ref, out_ref):
    """m_ref: (2, bb, L) f32 masses (channel-major); out_ref: (bb, L) combined masses."""
    # Build Z^T (zeta) and S^T (Moebius) on the fly from iota + bit ops:
    #   Z[k, i] = [k subset of i]
    #   S[k, i] = (-1)^{popcount(i \ k)} * [k subset of i]
    i_idx = lax.broadcasted_iota(jnp.int32, (L, L), 0)        # row    = i (source index)
    k_idx = lax.broadcasted_iota(jnp.int32, (L, L), 1)        # column = k (dest index)
    subset = jnp.bitwise_and(i_idx, k_idx) == k_idx           # k subset of i
    # Popcount parity of i \ k.  On subset entries i & ~k == i ^ k, and non-subset entries are
    # zeroed by the outer where, so i ^ k (< 16 -> only two folds) suffices.
    par = jnp.bitwise_xor(i_idx, k_idx)
    par = jnp.bitwise_xor(par, par >> 2)
    par = jnp.bitwise_xor(par, par >> 1)
    odd = jnp.bitwise_and(par, 1) == 1
    zt = jnp.where(subset, 1.0, 0.0)                          # Z^T[i, k]
    st = jnp.where(subset, jnp.where(odd, -1.0, 1.0), 0.0)    # S^T[i, k]

    q0 = jnp.dot(m_ref[0], zt, preferred_element_type=jnp.float32)   # (bb, L) commonalities
    q1 = jnp.dot(m_ref[1], zt, preferred_element_type=jnp.float32)
    p = q0 * q1                                                       # conjunctive combination
    out_ref[...] = jnp.dot(p, st, preferred_element_type=jnp.float32)  # back to masses


def _cost_estimate(batch):
    flops = batch * (3 * 2 * L * L + L)
    bytes_accessed = batch * (2 * L + L) * 4
    return pl.CostEstimate(flops=flops, transcendentals=0, bytes_accessed=bytes_accessed)


def _combine_pallas(x, nblk, bb):
    """x: (2, nblk*bb, L) f32  ->  (nblk*bb, L) f32."""
    total = nblk * bb
    if nblk == 1:
        # Gridless: whole problem as full-array VMEM blocks (no pipeline prologue/epilogue).
        return pl.pallas_call(
            dst_kernel,
            out_shape=jax.ShapeDtypeStruct((total, L), jnp.float32),
            in_specs=[pl.BlockSpec(memory_space=pltpu.MemorySpace.VMEM)],
            out_specs=pl.BlockSpec(memory_space=pltpu.MemorySpace.VMEM),
            cost_estimate=_cost_estimate(total),
        )(x)
    # Batch-tiled grid; "parallel" lets v7x shard blocks across its two TensorCores.
    return pl.pallas_call(
        dst_kernel,
        out_shape=jax.ShapeDtypeStruct((total, L), jnp.float32),
        grid_spec=pltpu.PrefetchScalarGridSpec(
            num_scalar_prefetch=0,
            grid=(nblk,),
            in_specs=[pl.BlockSpec((2, bb, L), lambda i: (0, i, 0))],
            out_specs=pl.BlockSpec((bb, L), lambda i: (i, 0)),
        ),
        compiler_params=pltpu.CompilerParams(dimension_semantics=("parallel",)),
        cost_estimate=_cost_estimate(total),
    )(x)


@functools.partial(jax.jit, static_argnames=("block_b",))
def cnndstv2_combine(m12, *, block_b=512):
    """Batched Dempster combination: (B, 2, 2**N) pairs -> (B, 2**N) combined masses."""
    B = m12.shape[0]
    assert m12.shape[1:] == (2, L), m12.shape
    x = jnp.transpose(m12.astype(jnp.float32), (1, 0, 2))        # (2, B, L) channel-major
    if B <= block_b:
        nblk, bb = 1, B
    else:
        assert block_b % 8 == 0, "batch tile must be sublane aligned"
        nblk = pl.cdiv(B, block_b)
        bb = block_b
        pad = nblk * bb - B
        if pad:
            x = jnp.pad(x, ((0, 0), (0, pad), (0, 0)))
    out = _combine_pallas(x, nblk, bb)
    return out[:B]


@jax.jit
def cnndstv2_forward(m12):
    """Torch-module-equivalent forward: (1, 2, 2**N) -> (1, 2**N, 1, 1)."""
    assert m12.shape == (1, 2, L), m12.shape
    out = cnndstv2_combine(m12)                                   # (1, L)
    # torch: stack -> (2**N, 1, 1, 1) -> permute(3, 0, 2, 1) -> (1, 2**N, 1, 1)
    return out.reshape(1, L, 1, 1)


def _ref_forward_np(m12_np, n):
    """Pure numpy re-implementation of the PyTorch recursion (correctness reference)."""
    def level(items, w0, w1):
        out = []
        for x, name in items:
            g0 = w0[0] * x[..., 0::2] + w0[1] * x[..., 1::2]
            g1 = w1[0] * x[..., 0::2] + w1[1] * x[..., 1::2]
            out.append((g0, '0' + name))
            out.append((g1, '1' + name))
        return out

    m = [(m12_np, '')]                                   # (1, 2, L)
    for _ in range(n):
        m = level(m, H2_W0, H2_W1)
    m.sort(key=lambda t: t[1])
    vals = np.stack([t[0][:, 0, :] * t[0][:, 1, :] for t in m])   # (2**n, 1, 1)
    sub = [(vals.reshape(1, 1, -1), '')]
    for _ in range(n):
        sub = level(sub, SUB_W0, SUB_W1)
    sub.sort(key=lambda t: t[1])
    sub = np.stack([t[0] for t in sub])                  # (2**n, 1, 1, 1)
    return np.transpose(sub, (3, 0, 2, 1))               # (1, 2**n, 1, 1)


if __name__ == "__main__":
    key = jax.random.PRNGKey(0)
    k1, k2, k3, k4 = jax.random.split(key, 4)

    # 1) Module-equivalent single pair (same layout as module.warmup()).
    m1 = jax.random.uniform(k1, (L,), dtype=jnp.float32).at[0].set(0.0)
    m2 = jax.random.uniform(k2, (L,), dtype=jnp.float32).at[0].set(0.0)
    m1 = m1 / m1.sum()
    m2 = m2 / m2.sum()
    m12 = jnp.stack([m1, m2])[None, ...]                 # (1, 2, L)
    out = jax.block_until_ready(cnndstv2_forward(m12))
    assert out.shape == (1, L, 1, 1)
    ref = _ref_forward_np(np.asarray(m12), N)
    np.testing.assert_allclose(np.asarray(out), ref, rtol=1e-5, atol=1e-6)

    # 2) Small batch -> gridless path.
    B1 = 8
    mb = jax.random.uniform(k3, (B1, 2, L), dtype=jnp.float32).at[:, :, 0].set(0.0)
    mb = mb / mb.sum(axis=-1, keepdims=True)
    out_b = jax.block_until_ready(cnndstv2_combine(mb))
    assert out_b.shape == (B1, L)
    for i in range(B1):
        ref_i = _ref_forward_np(np.asarray(mb[i:i + 1]), N).reshape(L)
        np.testing.assert_allclose(np.asarray(out_b[i]), ref_i, rtol=1e-5, atol=1e-6)

    # 3) Larger batch with a small tile -> tiled grid + "parallel" (v7x dual-TC) path,
    #    non-divisible batch also exercises the padding logic.
    B2 = 36
    mbig = jax.random.uniform(k4, (B2, 2, L), dtype=jnp.float32).at[:, :, 0].set(0.0)
    mbig = mbig / mbig.sum(axis=-1, keepdims=True)
    out_big = jax.block_until_ready(cnndstv2_combine(mbig, block_b=8))
    assert out_big.shape == (B2, L)
    for i in range(B2):
        ref_i = _ref_forward_np(np.asarray(mbig[i:i + 1]), N).reshape(L)
        np.testing.assert_allclose(np.asarray(out_big[i]), ref_i, rtol=1e-5, atol=1e-6)

    print("KERNEL_OK")
</pallas_src>

<mosaic_0001>
module attributes {stable_mosaic.version = 11 : i64} {
  func.func @dst_kernel(%arg0: memref<2x1x16xf32, #tpu.memory_space<vmem>>, %arg1: memref<1x16xf32, #tpu.memory_space<vmem>>) attributes {dimension_semantics = [], scalar_prefetch = 0 : i64, scratch_operands = 0 : i64, tpu.core_type = #tpu.core_type<tc>} {
    %0 = tpu.iota {dimensions = array<i32: 0>} : vector<16x16xi32>
    %1 = tpu.iota {dimensions = array<i32: 1>} : vector<16x16xi32>
    %2 = arith.andi %0, %1 : vector<16x16xi32>
    %3 = arith.cmpi eq, %2, %1 : vector<16x16xi32>
    %4 = arith.xori %0, %1 : vector<16x16xi32>
    %c2_i32 = arith.constant 2 : i32
    %5 = vector.broadcast %c2_i32 : i32 to vector<16x16xi32>
    %6 = arith.shrsi %4, %5 : vector<16x16xi32>
    %7 = arith.xori %4, %6 : vector<16x16xi32>
    %c1_i32 = arith.constant 1 : i32
    %8 = vector.broadcast %c1_i32 : i32 to vector<16x16xi32>
    %9 = arith.shrsi %7, %8 : vector<16x16xi32>
    %10 = arith.xori %7, %9 : vector<16x16xi32>
    %c1_i32_0 = arith.constant 1 : i32
    %11 = vector.broadcast %c1_i32_0 : i32 to vector<16x16xi32>
    %12 = arith.andi %10, %11 : vector<16x16xi32>
    %c1_i32_1 = arith.constant 1 : i32
    %13 = vector.broadcast %c1_i32_1 : i32 to vector<16x16xi32>
    %14 = arith.cmpi eq, %12, %13 : vector<16x16xi32>
    %cst = arith.constant 1.000000e+00 : f32
    %cst_2 = arith.constant 0.000000e+00 : f32
    %15 = vector.broadcast %cst : f32 to vector<16x16xf32>
    %16 = vector.broadcast %cst_2 : f32 to vector<16x16xf32>
    %17 = arith.select %3, %15, %16 : vector<16x16xi1>, vector<16x16xf32>
    %cst_3 = arith.constant -1.000000e+00 : f32
    %cst_4 = arith.constant 1.000000e+00 : f32
    %18 = vector.broadcast %cst_3 : f32 to vector<16x16xf32>
    %19 = vector.broadcast %cst_4 : f32 to vector<16x16xf32>
    %20 = arith.select %14, %18, %19 : vector<16x16xi1>, vector<16x16xf32>
    %cst_5 = arith.constant 0.000000e+00 : f32
    %21 = vector.broadcast %cst_5 : f32 to vector<16x16xf32>
    %22 = arith.select %3, %20, %21 : vector<16x16xi1>, vector<16x16xf32>
    %c0 = arith.constant 0 : index
    %c0_6 = arith.constant 0 : index
    %c0_7 = arith.constant 0 : index
    %23 = vector.load %arg0[%c0, %c0_6, %c0_7] : memref<2x1x16xf32, #tpu.memory_space<vmem>>, vector<1x1x16xf32>
    %24 = vector.shape_cast %23 : vector<1x1x16xf32> to vector<1x16xf32>
    %cst_8 = arith.constant dense<0.000000e+00> : vector<1x16xf32>
    %25 = tpu.matmul %24, %17, %cst_8 {dimension_numbers = #tpu.dot_dimension_numbers<[1], [0], [0], [1], [0, 0, 1, 1], [], []>} : vector<1x16xf32>, vector<16x16xf32>, vector<1x16xf32> -> vector<1x16xf32>
    %c1 = arith.constant 1 : index
    %c0_9 = arith.constant 0 : index
    %c0_10 = arith.constant 0 : index
    %26 = vector.load %arg0[%c1, %c0_9, %c0_10] : memref<2x1x16xf32, #tpu.memory_space<vmem>>, vector<1x1x16xf32>
    %27 = vector.shape_cast %26 : vector<1x1x16xf32> to vector<1x16xf32>
    %cst_11 = arith.constant dense<0.000000e+00> : vector<1x16xf32>
    %28 = tpu.matmul %27, %17, %cst_11 {dimension_numbers = #tpu.dot_dimension_numbers<[1], [0], [0], [1], [0, 0, 1, 1], [], []>} : vector<1x16xf32>, vector<16x16xf32>, vector<1x16xf32> -> vector<1x16xf32>
    %29 = arith.mulf %25, %28 : vector<1x16xf32>
    %cst_12 = arith.constant dense<0.000000e+00> : vector<1x16xf32>
    %30 = tpu.matmul %29, %22, %cst_12 {dimension_numbers = #tpu.dot_dimension_numbers<[1], [0], [0], [1], [0, 0, 1, 1], [], []>} : vector<1x16xf32>, vector<16x16xf32>, vector<1x16xf32> -> vector<1x16xf32>
    %c0_13 = arith.constant 0 : index
    %c0_14 = arith.constant 0 : index
    %31 = vector.load %arg1[%c0_13, %c0_14] : memref<1x16xf32, #tpu.memory_space<vmem>>, vector<1x16xf32>
    tpu.vector_store %arg1[%c0_13, %c0_14], %30 {strides = array<i32>} : memref<1x16xf32, #tpu.memory_space<vmem>>, vector<1x16xf32>,
    return
  }
}

</mosaic_0001>

<bundles_post_ra>
// kernel: cnndstv2_combine.1
= control target key start
LH: loop header
LB: loop body
LE: loop exit
PB: predicated region body
PF: predicated region fallthrough
CT: control target
= control target key end

     0   :  { %v9_v0 = vlaneseq  ;;  %v358_v1 = vmov 0.0|0.0   ;;  %vm359_vm0 = vmmov 0   ;;  %v360_v4 = vmov 0.0   ;;  %s408_s0 = inlined_call_operand.vmem [shape: f32[2,1,16], index: 0, kind: input, shape index: {}]   ;;  %s409_s1 = inlined_call_operand.hbm [shape: f32[1,16], index: 1, kind: output, shape index: {}]  }
   0x1   :  { %318 = vmatprep.subr.bf16.mxu0 %v358_v1  ;;  %321 = vmatprep.subr.bf16.mxu1 %v358_v1 }
   0x2   :  { %v10_v2 = vshrl.u32 %v9_v0, 7  ;;  %v13_v3 = vand.u32 127, %v9_v0  ;;  %301 = vmatprep.mubr.msk.f32.mxu0 %vm359_vm0, %v360_v4  ;;  %308 = vmatprep.mubr.msk.f32.mxu1 %vm359_vm0, %v360_v4 }
   0x3   :  { %6 = vsyncpa [#allocation3], 0  ;;  %v361_v15 = vmov 1.0|1.0   ;;  %v38_v16 = vld [vmem:[%s408_s0] sm:$0x1] }
   0x4   :  { %v11_v5 = vadd.s32 8, %v10_v2  ;;  %v14_v6 = vand.u32 %v13_v3, %v10_v2  ;;  %v18_v7 = vxor.u32 %v13_v3, %v10_v2  ;;  %vm39_vm4 = vcmask 130048   ;;  %v281_v17 = vld [vmem:[%s408_s0 + $0x1] sm:$0x1]  ;;  %s363_s0 = smov [#allocation2]  }
   0x5   :  { %v362_v24 = vmov 1.0   ;;  %s270_s10 = sshll.u32 %s363_s0, 4  ;;  %vm262_vm7 = vcmask 122880   ;;  %s271_s10 = int_to_ptr.vmem [resolvable:$true] %s270_s10 }
   0x6   :  { %v15_v8 = vand.u32 %v13_v3, %v11_v5  ;;  %vm16_vm1 = vcmp.eq.s32.totalorder %v14_v6, %v13_v3  ;;  %v19_v9 = vxor.u32 %v13_v3, %v11_v5  ;;  %v20_v10 = vshra.s32 %v18_v7, 2  ;;  %s334_s11 = scalar_lea.vmem %s271_s10, 16  ;;  %s338_s12 = scalar_lea.vmem %s271_s10, 32 }
   0x7   :  { %p335_p0 = scmp.ne.s32.totalorder %s271_s10, %s334_s11  ;;  %p339_p1 = scmp.lt.s32.totalorder %s271_s10, %s271_s10 }
   0x8   :  { %vm17_vm2 = vcmp.eq.s32.totalorder %v15_v8, %v13_v3  ;;  %v21_v11 = vshra.s32 %v19_v9, 2  ;;  %v22_v12 = vxor.u32 %v20_v10, %v18_v7  ;;  %p340_p2 = scmp.lt.s32.totalorder %s338_s12, %s334_s11 }
   0x9   :  { %vm376_vm3 = vmpackc.low %vm17_vm2, %vm16_vm1 }
   0xa   :  { %v23_v14 = vxor.u32 %v21_v11, %v19_v9  ;;  %320 = vmatpush3.bf16.msk.msra.mxu0 %vm376_vm3, %v361_v15  ;;  %323 = vmatpush3.bf16.msk.msra.mxu1 %vm376_vm3, %v361_v15  ;;  %v24_v18 = vshra.s32 %v22_v12, 1  ;;  %p341_p3 = por %p340_p2, %p339_p1 }
   0xb   :  { %324 = vmatprep.subr.bf16.mxu0 %v358_v1 }
   0xc   :  { %v25_v19 = vshra.s32 %v23_v14, 1  ;;  %v26_v20 = vxor.u32 %v24_v18, %v22_v12  ;;  %p342_p4 = pnand %p341_p3, %p335_p0 }
   0xd   :  { %302 = vmatmul.mubr.msk.f32.vlgmr.msra.gmra.mrb[0].mxu0 %vm39_vm4, %v38_v16  ;;  %309 = vmatmul.mubr.msk.f32.vlgmr.msra.gmra.mrb[0].mxu1 %vm39_vm4, %v281_v17 }
   0xe   :  { %v27_v21 = vxor.u32 %v25_v19, %v23_v14  ;;  %v28_v22 = vand.u32 1, %v26_v20  ;;  %315 = vmatprep.mubr.msk.f32.mxu0 %vm359_vm0, %v360_v4 }
  0x10   :  { %v29_v23 = vand.u32 1, %v27_v21  ;;  %vm30_vm5 = vcmp.eq.s32.totalorder %v28_v22, 1 }
  0x11   :  { %v34_v25 = vsel %vm30_vm5, -1.0, %v362_v24 }
  0x12   :  { %vm31_vm6 = vcmp.eq.s32.totalorder %v29_v23, 1 }
  0x13   :  { %v35_v26 = vsel %vm31_vm6, -1.0, %v362_v24 }
  0x14   :  { %v325_v27 = vpack.c.bf16 %v35_v26, %v34_v25 }
  0x16   :  { %327 = vmatpush3.bf16.msk.msra.mxu0 %vm376_vm3, %v325_v27 }
  0xe0   :  { %v109_v28 = vpop.f32.mrb[0].mxu0  ;;  %v184_v29 = vpop.f32.mrb[0].mxu1 }
  0xe1   :  { %v188_v30 = vmul.f32 %v184_v29, %v109_v28  ;;  %v303_v31 = vpop.f32.mrb[1].mxu0  ;;  %v310_v32 = vpop.f32.mrb[1].mxu1 }
  0xe3   :  { %316 = vmatmul.mubr.msk.f32.vlgmr.msra.gmra.mrb[2].mxu0 %vm39_vm4, %v188_v30 }
 0x1b6   :  { %v258_v33 = vpop.f32.mrb[2].mxu0 }
 0x1b7   :  { %263 = vst.msk [vmem:[#allocation2] sm:$0x1] %vm262_vm7, %v258_v33  ;;  %v317_v34 = vpop.f32.mrb[3].mxu0 }
 0x1b8   :  { %345 = shalt.err (!%p342_p4)
}
 0x1b9   :  { %s346_s15 = scalar_lea.hbm %s409_s1, 16 }
 0x1ba   :  { %p347_p5 = scmp.ne.s32.totalorder %s409_s1, %s346_s15  ;;  %p350_p6 = scmp.lt.u32.totalorder %s346_s15, %s409_s1 }
 0x1bc   :  { %p352_p7 = pnand %p350_p6, %p347_p5 }
 0x1be   :  { %355 = shalt.err (!%p352_p7)
}
 0x1bf   :  { %273 = dma.vmem_to_hbm [thread:$0]  %s271_s10, 16, %s409_s1, [#allocation3]  }
 0x1c0   :  { %356 = dma.done.wait [#allocation3], 16  }
 0x1c1   :  { %357 = vsyncadd [#allocation3], 4294967280 }
 0x1c2   :  { %277 = vsyncpa [#allocation3], 1 }

</bundles_post_ra>
